<compile_context>
chip_gen: v6e
topology: v6e:2x2x1
jax: 0.10.0
libtpu: 0.0.40
codegen_flags: <defaults>
</compile_context>

<pallas_src>
import jax
import jax.numpy as jnp
from jax.experimental import pallas as pl
from jax.experimental.pallas import tpu as pltpu

_NEG_BIG = -1e30


def _round_up(x, m):
    return (x + m - 1) // m * m


def _choose_tile_v(vp):
    # Vp is always a multiple of 128; prefer 512/256 (v6e/v7x MXU-friendly).
    for t in (512, 256, 128):
        if vp % t == 0:
            return t
    return vp


def _attn_decoder_kernel(x_ref, h0_ref, c0_ref, enc_ref, bias_ref,
                         w_ih_t_ref, w_hh_t_ref, b_gates_ref,
                         w_ctx_ref, w_h_ref, b_out_ref,
                         out_ref, hn_ref, cn_ref, attn_ref,
                         h_scr, c_scr, ctx_scr, attn_scr):
    H = h0_ref.shape[-1]
    j = pl.program_id(0)

    # ---- state (LSTM cell + attention): computed once, carried in scratch ----
    @pl.when(j == 0)
    def _state():
        # Fused gate matmul, split as x @ W_ih^T + h0 @ W_hh^T (no HBM concat).
        gates = (jnp.dot(x_ref[...].astype(jnp.bfloat16), w_ih_t_ref[...],
                         preferred_element_type=jnp.float32)
                 + jnp.dot(h0_ref[...].astype(jnp.bfloat16), w_hh_t_ref[...],
                           preferred_element_type=jnp.float32)
                 + b_gates_ref[...])                          # (Bp, 4H) f32
        i_g = jax.nn.sigmoid(gates[:, 0 * H:1 * H])
        f_g = jax.nn.sigmoid(gates[:, 1 * H:2 * H])
        g_g = jnp.tanh(gates[:, 2 * H:3 * H])
        o_g = jax.nn.sigmoid(gates[:, 3 * H:4 * H])
        c_new = f_g * c0_ref[...] + i_g * g_g
        h_new = o_g * jnp.tanh(c_new)                         # (Bp, H) f32

        # Global dot-product attention from the single bf16 (B,S,H) copy.
        enc = enc_ref[...].astype(jnp.float32)                # cast in vregs only
        scores = jnp.sum(enc * h_new[:, None, :], axis=-1)    # (Bp, S) lane reduce
        scores = scores + bias_ref[...]                       # additive mask bias
        m = jnp.max(scores, axis=-1, keepdims=True)
        e = jnp.exp(scores - m)
        attn_w = e * pl.reciprocal(jnp.sum(e, axis=-1, keepdims=True), approx=True)
        context = jnp.sum(enc * attn_w[:, :, None], axis=1)   # (Bp, H) sublane reduce

        h_scr[...] = h_new
        c_scr[...] = c_new
        ctx_scr[...] = context
        attn_scr[...] = attn_w

    # ---- output projection, one vocab tile per grid step ---------------------
    out_ref[...] = (jnp.dot(ctx_scr[...].astype(jnp.bfloat16), w_ctx_ref[...],
                            preferred_element_type=jnp.float32)
                    + jnp.dot(h_scr[...].astype(jnp.bfloat16), w_h_ref[...],
                              preferred_element_type=jnp.float32)
                    + b_out_ref[...])                         # (Bp, TILE_V) f32

    # ---- write the (grid-resident) state outputs once at the last tile -------
    @pl.when(j == pl.num_programs(0) - 1)
    def _finalize():
        hn_ref[...] = h_scr[...]
        cn_ref[...] = c_scr[...]
        attn_ref[...] = attn_scr[...]


def prepare_params(raw):
    """One-time weight preparation (transpose / split / pad / bf16 cast)."""
    H = raw["w_hh"].shape[1]
    E = raw["w_ih"].shape[1]
    V = raw["w_out"].shape[0]
    Vp = _round_up(V, 128)                                    # lane-dense logits
    w_out_t = raw["w_out"].T                                  # (2H, V)
    w_ctx = jnp.pad(w_out_t[:H], ((0, 0), (0, Vp - V)))       # (H, Vp)
    w_h = jnp.pad(w_out_t[H:], ((0, 0), (0, Vp - V)))         # (H, Vp)
    b_out = jnp.pad(raw["b_out"], ((0, Vp - V),))
    return {
        "embedding": raw["embedding"].astype(jnp.float32),
        "w_ih_t": raw["w_ih"].T.astype(jnp.bfloat16),         # (E, 4H)
        "w_hh_t": raw["w_hh"].T.astype(jnp.bfloat16),         # (H, 4H)
        "b_gates": (raw["b_ih"] + raw["b_hh"]).reshape(1, 4 * H).astype(jnp.float32),
        "w_ctx": w_ctx.astype(jnp.bfloat16),
        "w_h": w_h.astype(jnp.bfloat16),
        "b_out": b_out.reshape(1, Vp).astype(jnp.float32),
        "num_vocab": V,
        "hidden_size": H,
        "embedding_dim": E,
    }


def global_attention_decoder_forward(decoder_input, hidden, encoder_outputs,
                                     prepared, mask=None):
    """Mirrors GlobalAttentionDecoder.forward (decoder seq_len must be 1).

    decoder_input   : (B, 1) int32 token ids
    hidden          : (h0, c0), each (1, B, H)
    encoder_outputs : (S_enc, B, H)
    mask            : optional (B, S_enc); nonzero entries are masked out
    returns (output (1, B, V), (h_n, c_n) each (1, B, H), attn_weights (B, S_enc, 1))
    """
    h0, c0 = hidden
    B, s_dec = decoder_input.shape
    assert s_dec == 1, "GlobalAttentionDecoder requires decoder seq_len == 1"
    S_enc = encoder_outputs.shape[0]
    H = prepared["hidden_size"]
    E = prepared["embedding_dim"]
    V = prepared["num_vocab"]
    Vp = prepared["w_ctx"].shape[1]
    Bp = _round_up(B, 8)                                      # 8-sublane batch pad
    TILE_V = _choose_tile_v(Vp)
    n_vt = Vp // TILE_V

    # Glue ops: embedding gather, batch padding, single encoder transpose (bf16).
    x = prepared["embedding"][decoder_input[:, 0]]            # (B, E)
    padb = ((0, Bp - B), (0, 0))
    x_p = jnp.pad(x, padb)
    h0_p = jnp.pad(h0[0].astype(jnp.float32), padb)
    c0_p = jnp.pad(c0[0].astype(jnp.float32), padb)
    enc = jnp.transpose(encoder_outputs, (1, 0, 2)).astype(jnp.bfloat16)  # (B,S,H)
    enc_p = jnp.pad(enc, ((0, Bp - B), (0, 0), (0, 0)))
    if mask is None:
        bias_p = jnp.zeros((Bp, S_enc), jnp.float32)
    else:
        bias = jnp.where(mask > 0, _NEG_BIG, 0.0).astype(jnp.float32)
        bias_p = jnp.pad(bias, ((0, Bp - B), (0, 0)))

    grid_spec = pltpu.PrefetchScalarGridSpec(
        num_scalar_prefetch=0,
        grid=(n_vt,),
        in_specs=[
            pl.BlockSpec((Bp, E), lambda j: (0, 0)),                # x (embedded)
            pl.BlockSpec((Bp, H), lambda j: (0, 0)),                # h0
            pl.BlockSpec((Bp, H), lambda j: (0, 0)),                # c0
            pl.BlockSpec((Bp, S_enc, H), lambda j: (0, 0, 0)),      # encoder (bf16)
            pl.BlockSpec((Bp, S_enc), lambda j: (0, 0)),            # additive mask bias
            pl.BlockSpec((E, 4 * H), lambda j: (0, 0)),             # W_ih^T (bf16)
            pl.BlockSpec((H, 4 * H), lambda j: (0, 0)),             # W_hh^T (bf16)
            pl.BlockSpec((1, 4 * H), lambda j: (0, 0)),             # b_ih + b_hh
            pl.BlockSpec((H, TILE_V), lambda j: (0, j)),            # W_ctx tile (bf16)
            pl.BlockSpec((H, TILE_V), lambda j: (0, j)),            # W_h tile (bf16)
            pl.BlockSpec((1, TILE_V), lambda j: (0, j)),            # b_out tile
        ],
        out_specs=[
            pl.BlockSpec((Bp, TILE_V), lambda j: (0, j)),           # logits tile
            pl.BlockSpec((Bp, H), lambda j: (0, 0)),                # h_n
            pl.BlockSpec((Bp, H), lambda j: (0, 0)),                # c_n
            pl.BlockSpec((Bp, S_enc), lambda j: (0, 0)),            # attn weights
        ],
        scratch_shapes=[
            pltpu.VMEM((Bp, H), jnp.float32),      # h_new carry
            pltpu.VMEM((Bp, H), jnp.float32),      # c_new carry
            pltpu.VMEM((Bp, H), jnp.float32),      # context carry
            pltpu.VMEM((Bp, S_enc), jnp.float32),  # attn carry
        ],
    )

    out_p, hn_p, cn_p, attn_p = pl.pallas_call(
        _attn_decoder_kernel,
        grid_spec=grid_spec,
        out_shape=(
            jax.ShapeDtypeStruct((Bp, Vp), jnp.float32),
            jax.ShapeDtypeStruct((Bp, H), jnp.float32),
            jax.ShapeDtypeStruct((Bp, H), jnp.float32),
            jax.ShapeDtypeStruct((Bp, S_enc), jnp.float32),
        ),
        # State is carried across the vocab-tile axis in scratch -> "arbitrary".
        # (vmem_limit_bytes left at the compiler default; at production shapes
        #  derive it from the per-tile block sizes instead.)
        compiler_params=pltpu.CompilerParams(
            dimension_semantics=("arbitrary",)),
    )(x_p, h0_p, c0_p, enc_p, bias_p,
      prepared["w_ih_t"], prepared["w_hh_t"], prepared["b_gates"],
      prepared["w_ctx"], prepared["w_h"], prepared["b_out"])

    output = out_p[:B, :V][None]                 # (1, B, V)
    h_n = hn_p[:B][None]                         # (1, B, H)
    c_n = cn_p[:B][None]                         # (1, B, H)
    attn_weights = attn_p[:B][:, :, None]        # (B, S_enc, 1)
    return output, (h_n, c_n), attn_weights


def _reference(decoder_input, hidden, encoder_outputs, raw, mask=None):
    """Pure-JAX f32 reference with identical semantics to the PyTorch module."""
    h0, c0 = hidden
    H = h0.shape[-1]
    x = raw["embedding"][decoder_input[:, 0]]
    gates = (x @ raw["w_ih"].T + raw["b_ih"]
             + h0[0] @ raw["w_hh"].T + raw["b_hh"])
    i = jax.nn.sigmoid(gates[:, 0 * H:1 * H])
    f = jax.nn.sigmoid(gates[:, 1 * H:2 * H])
    g = jnp.tanh(gates[:, 2 * H:3 * H])
    o = jax.nn.sigmoid(gates[:, 3 * H:4 * H])
    c = f * c0[0] + i * g
    h = o * jnp.tanh(c)
    enc = jnp.transpose(encoder_outputs, (1, 0, 2))            # (B, S, H)
    scores = jnp.einsum("bsh,bh->bs", enc, h)
    if mask is not None:
        scores = jnp.where(mask > 0, _NEG_BIG, scores)
    attn_w = jax.nn.softmax(scores, axis=-1)
    context = jnp.einsum("bs,bsh->bh", attn_w, enc)
    out = jnp.concatenate([context, h], axis=-1) @ raw["w_out"].T + raw["b_out"]
    return out[None], (h[None], c[None]), attn_w[:, :, None]


if __name__ == "__main__":
    num_vocab = 32
    embedding_dim = 16
    hidden_size = 32
    batch = 4
    enc_seq_len = 8

    key = jax.random.PRNGKey(0)
    (k_emb, k_ih, k_hh, k_bih, k_bhh, k_wo, k_bo,
     k_in, k_h, k_c, k_enc, k_mask) = jax.random.split(key, 12)

    embedding = jax.random.normal(k_emb, (num_vocab, embedding_dim), jnp.float32) * 0.1
    embedding = embedding.at[0].set(0.0)        # padding_idx=0 -> zero row

    raw_params = {
        "embedding": embedding,
        "w_ih": jax.random.normal(k_ih, (4 * hidden_size, embedding_dim), jnp.float32) * 0.1,
        "w_hh": jax.random.normal(k_hh, (4 * hidden_size, hidden_size), jnp.float32) * 0.1,
        "b_ih": jax.random.normal(k_bih, (4 * hidden_size,), jnp.float32) * 0.1,
        "b_hh": jax.random.normal(k_bhh, (4 * hidden_size,), jnp.float32) * 0.1,
        "w_out": jax.random.normal(k_wo, (num_vocab, 2 * hidden_size), jnp.float32) * 0.1,
        "b_out": jax.random.normal(k_bo, (num_vocab,), jnp.float32) * 0.1,
    }
    prepared = prepare_params(raw_params)       # one-time, outside per-call path

    decoder_input = jax.random.randint(k_in, (batch, 1), 0, num_vocab, jnp.int32)
    h0 = jax.random.normal(k_h, (1, batch, hidden_size), jnp.float32) * 0.1
    c0 = jax.random.normal(k_c, (1, batch, hidden_size), jnp.float32) * 0.1
    encoder_outputs = jax.random.normal(
        k_enc, (enc_seq_len, batch, hidden_size), jnp.float32) * 0.1
    mask = (jax.random.uniform(k_mask, (batch, enc_seq_len)) < 0.3).astype(jnp.float32)
    mask = mask.at[:, 0].set(0.0)               # keep >=1 unmasked position per row

    for m in (mask, None):
        out, (h_n, c_n), attn_w = global_attention_decoder_forward(
            decoder_input, (h0, c0), encoder_outputs, prepared, mask=m)
        jax.block_until_ready((out, h_n, c_n, attn_w))

        r_out, (r_h, r_c), r_attn = _reference(
            decoder_input, (h0, c0), encoder_outputs, raw_params, mask=m)

        assert out.shape == (1, batch, num_vocab)
        assert h_n.shape == (1, batch, hidden_size)
        assert c_n.shape == (1, batch, hidden_size)
        assert attn_w.shape == (batch, enc_seq_len, 1)
        assert jnp.allclose(out, r_out, atol=2e-2), "output mismatch"
        assert jnp.allclose(h_n, r_h, atol=1e-2), "h_n mismatch"
        assert jnp.allclose(c_n, r_c, atol=1e-2), "c_n mismatch"
        assert jnp.allclose(attn_w, r_attn, atol=1e-2), "attn_weights mismatch"

    print("KERNEL_OK")
</pallas_src>

<mosaic_0001>
module attributes {stable_mosaic.version = 11 : i64} {
  func.func @_attn_decoder_kernel(%arg0: i32, %arg1: memref<8x16xf32, #tpu.memory_space<vmem>>, %arg2: memref<8x32xf32, #tpu.memory_space<vmem>>, %arg3: memref<8x32xf32, #tpu.memory_space<vmem>>, %arg4: memref<8x8x32xbf16, #tpu.memory_space<vmem>>, %arg5: memref<8x8xf32, #tpu.memory_space<vmem>>, %arg6: memref<16x128xbf16, #tpu.memory_space<vmem>>, %arg7: memref<32x128xbf16, #tpu.memory_space<vmem>>, %arg8: memref<1x128xf32, #tpu.memory_space<vmem>>, %arg9: memref<32x128xbf16, #tpu.memory_space<vmem>>, %arg10: memref<32x128xbf16, #tpu.memory_space<vmem>>, %arg11: memref<1x128xf32, #tpu.memory_space<vmem>>, %arg12: memref<8x128xf32, #tpu.memory_space<vmem>>, %arg13: memref<8x32xf32, #tpu.memory_space<vmem>>, %arg14: memref<8x32xf32, #tpu.memory_space<vmem>>, %arg15: memref<8x8xf32, #tpu.memory_space<vmem>>, %arg16: memref<8x32xf32, #tpu.memory_space<vmem>>, %arg17: memref<8x32xf32, #tpu.memory_space<vmem>>, %arg18: memref<8x32xf32, #tpu.memory_space<vmem>>, %arg19: memref<8x8xf32, #tpu.memory_space<vmem>>) attributes {dimension_semantics = [#tpu.dimension_semantics<arbitrary>], iteration_bounds = array<i64: 1>, scalar_prefetch = 0 : i64, scratch_operands = 4 : i64, tpu.core_type = #tpu.core_type<tc>, window_params = [{pipeline_mode = #tpu.pipeline_mode<synchronous>, transform_indices = @transform_0, window_bounds = array<i64: 8, 16>}, {pipeline_mode = #tpu.pipeline_mode<synchronous>, transform_indices = @transform_1, window_bounds = array<i64: 8, 32>}, {pipeline_mode = #tpu.pipeline_mode<synchronous>, transform_indices = @transform_2, window_bounds = array<i64: 8, 32>}, {pipeline_mode = #tpu.pipeline_mode<synchronous>, transform_indices = @transform_3, window_bounds = array<i64: 8, 8, 32>}, {pipeline_mode = #tpu.pipeline_mode<synchronous>, transform_indices = @transform_4, window_bounds = array<i64: 8, 8>}, {pipeline_mode = #tpu.pipeline_mode<synchronous>, transform_indices = @transform_5, window_bounds = array<i64: 16, 128>}, {pipeline_mode = #tpu.pipeline_mode<synchronous>, transform_indices = @transform_6, window_bounds = array<i64: 32, 128>}, {pipeline_mode = #tpu.pipeline_mode<synchronous>, transform_indices = @transform_7, window_bounds = array<i64: 1, 128>}, {transform_indices = @transform_8, window_bounds = array<i64: 32, 128>}, {transform_indices = @transform_9, window_bounds = array<i64: 32, 128>}, {transform_indices = @transform_10, window_bounds = array<i64: 1, 128>}, {transform_indices = @transform_11, window_bounds = array<i64: 8, 128>}, {pipeline_mode = #tpu.pipeline_mode<synchronous>, transform_indices = @transform_12, window_bounds = array<i64: 8, 32>}, {pipeline_mode = #tpu.pipeline_mode<synchronous>, transform_indices = @transform_13, window_bounds = array<i64: 8, 32>}, {pipeline_mode = #tpu.pipeline_mode<synchronous>, transform_indices = @transform_14, window_bounds = array<i64: 8, 8>}]} {
    %c0_i32 = arith.constant 0 : i32
    %0 = arith.cmpi eq, %arg0, %c0_i32 : i32
    %1 = arith.extui %0 : i1 to i32
    %c0_i32_0 = arith.constant 0 : i32
    %2 = arith.cmpi ne, %1, %c0_i32_0 : i32
    scf.if %2 {
      %c0_15 = arith.constant 0 : index
      %c0_16 = arith.constant 0 : index
      %19 = vector.load %arg1[%c0_15, %c0_16] : memref<8x16xf32, #tpu.memory_space<vmem>>, vector<8x16xf32>
      %20 = arith.truncf %19 : vector<8x16xf32> to vector<8x16xbf16>
      %c0_17 = arith.constant 0 : index
      %c0_18 = arith.constant 0 : index
      %21 = vector.load %arg6[%c0_17, %c0_18] : memref<16x128xbf16, #tpu.memory_space<vmem>>, vector<16x128xbf16>
      %cst_19 = arith.constant dense<0.000000e+00> : vector<8x128xf32>
      %22 = tpu.matmul %20, %21, %cst_19 {dimension_numbers = #tpu.dot_dimension_numbers<[1], [0], [0], [1], [0, 0, 1, 1], [], []>} : vector<8x16xbf16>, vector<16x128xbf16>, vector<8x128xf32> -> vector<8x128xf32>
      %c0_20 = arith.constant 0 : index
      %c0_21 = arith.constant 0 : index
      %23 = vector.load %arg2[%c0_20, %c0_21] : memref<8x32xf32, #tpu.memory_space<vmem>>, vector<8x32xf32>
      %24 = arith.truncf %23 : vector<8x32xf32> to vector<8x32xbf16>
      %c0_22 = arith.constant 0 : index
      %c0_23 = arith.constant 0 : index
      %25 = vector.load %arg7[%c0_22, %c0_23] : memref<32x128xbf16, #tpu.memory_space<vmem>>, vector<32x128xbf16>
      %cst_24 = arith.constant dense<0.000000e+00> : vector<8x128xf32>
      %26 = tpu.matmul %24, %25, %cst_24 {dimension_numbers = #tpu.dot_dimension_numbers<[1], [0], [0], [1], [0, 0, 1, 1], [], []>} : vector<8x32xbf16>, vector<32x128xbf16>, vector<8x128xf32> -> vector<8x128xf32>
      %27 = arith.addf %22, %26 : vector<8x128xf32>
      %c0_25 = arith.constant 0 : index
      %c0_26 = arith.constant 0 : index
      %28 = vector.load %arg8[%c0_25, %c0_26] : memref<1x128xf32, #tpu.memory_space<vmem>>, vector<1x128xf32>
      %29 = vector.broadcast %28 : vector<1x128xf32> to vector<8x128xf32>
      %30 = arith.addf %27, %29 : vector<8x128xf32>
      %31 = vector.extract_strided_slice %30 {offsets = [0, 0], sizes = [8, 32], strides = [1, 1]} : vector<8x128xf32> to vector<8x32xf32>
      %32 = arith.negf %31 : vector<8x32xf32>
      %33 = math.exp %32 : vector<8x32xf32>
      %cst_27 = arith.constant 1.000000e+00 : f32
      %34 = vector.broadcast %cst_27 : f32 to vector<8x32xf32>
      %35 = arith.addf %34, %33 : vector<8x32xf32>
      %36 = arith.divf %34, %35 : vector<8x32xf32>
      %37 = vector.extract_strided_slice %30 {offsets = [0, 32], sizes = [8, 32], strides = [1, 1]} : vector<8x128xf32> to vector<8x32xf32>
      %38 = arith.negf %37 : vector<8x32xf32>
      %39 = math.exp %38 : vector<8x32xf32>
      %cst_28 = arith.constant 1.000000e+00 : f32
      %40 = vector.broadcast %cst_28 : f32 to vector<8x32xf32>
      %41 = arith.addf %40, %39 : vector<8x32xf32>
      %42 = arith.divf %40, %41 : vector<8x32xf32>
      %43 = vector.extract_strided_slice %30 {offsets = [0, 64], sizes = [8, 32], strides = [1, 1]} : vector<8x128xf32> to vector<8x32xf32>
      %44 = math.tanh %43 : vector<8x32xf32>
      %45 = vector.extract_strided_slice %30 {offsets = [0, 96], sizes = [8, 32], strides = [1, 1]} : vector<8x128xf32> to vector<8x32xf32>
      %46 = arith.negf %45 : vector<8x32xf32>
      %47 = math.exp %46 : vector<8x32xf32>
      %cst_29 = arith.constant 1.000000e+00 : f32
      %48 = vector.broadcast %cst_29 : f32 to vector<8x32xf32>
      %49 = arith.addf %48, %47 : vector<8x32xf32>
      %50 = arith.divf %48, %49 : vector<8x32xf32>
      %c0_30 = arith.constant 0 : index
      %c0_31 = arith.constant 0 : index
      %51 = vector.load %arg3[%c0_30, %c0_31] : memref<8x32xf32, #tpu.memory_space<vmem>>, vector<8x32xf32>
      %52 = arith.mulf %42, %51 : vector<8x32xf32>
      %53 = arith.mulf %36, %44 : vector<8x32xf32>
      %54 = arith.addf %52, %53 : vector<8x32xf32>
      %55 = math.tanh %54 : vector<8x32xf32>
      %56 = arith.mulf %50, %55 : vector<8x32xf32>
      %c0_32 = arith.constant 0 : index
      %c0_33 = arith.constant 0 : index
      %c0_34 = arith.constant 0 : index
      %57 = vector.load %arg4[%c0_32, %c0_33, %c0_34] : memref<8x8x32xbf16, #tpu.memory_space<vmem>>, vector<8x8x32xbf16>
      %58 = arith.extf %57 : vector<8x8x32xbf16> to vector<8x8x32xf32>
      %59 = vector.shape_cast %56 : vector<8x32xf32> to vector<8x1x32xf32>
      %60 = vector.broadcast %59 : vector<8x1x32xf32> to vector<8x8x32xf32>
      %61 = arith.mulf %58, %60 : vector<8x8x32xf32>
      %cst_35 = arith.constant dense<0.000000e+00> : vector<8x8xf32>
      %62 = vector.multi_reduction <add>, %61, %cst_35 [2] : vector<8x8x32xf32> to vector<8x8xf32>
      %c0_36 = arith.constant 0 : index
      %c0_37 = arith.constant 0 : index
      %63 = vector.load %arg5[%c0_36, %c0_37] : memref<8x8xf32, #tpu.memory_space<vmem>>, vector<8x8xf32>
      %64 = arith.addf %62, %63 : vector<8x8xf32>
      %cst_38 = arith.constant dense<0xFF800000> : vector<8xf32>
      %65 = vector.multi_reduction <maximumf>, %64, %cst_38 [1] : vector<8x8xf32> to vector<8xf32>
      %66 = vector.shape_cast %65 : vector<8xf32> to vector<8x1xf32>
      %67 = vector.broadcast %66 : vector<8x1xf32> to vector<8x8xf32>
      %68 = arith.subf %64, %67 : vector<8x8xf32>
      %69 = math.exp %68 : vector<8x8xf32>
      %cst_39 = arith.constant dense<0.000000e+00> : vector<8xf32>
      %70 = vector.multi_reduction <add>, %69, %cst_39 [1] : vector<8x8xf32> to vector<8xf32>
      %71 = vector.shape_cast %70 : vector<8xf32> to vector<8x1xf32>
      %72 = tpu.reciprocal %71 {approx = true} : vector<8x1xf32> -> vector<8x1xf32>
      %73 = vector.broadcast %72 : vector<8x1xf32> to vector<8x8xf32>
      %74 = arith.mulf %69, %73 : vector<8x8xf32>
      %75 = vector.shape_cast %74 : vector<8x8xf32> to vector<8x8x1xf32>
      %76 = vector.broadcast %75 : vector<8x8x1xf32> to vector<8x8x32xf32>
      %77 = arith.mulf %58, %76 : vector<8x8x32xf32>
      %cst_40 = arith.constant dense<0.000000e+00> : vector<8x32xf32>
      %78 = vector.multi_reduction <add>, %77, %cst_40 [1] : vector<8x8x32xf32> to vector<8x32xf32>
      %c0_41 = arith.constant 0 : index
      %c0_42 = arith.constant 0 : index
      %79 = vector.load %arg16[%c0_41, %c0_42] : memref<8x32xf32, #tpu.memory_space<vmem>>, vector<8x32xf32>
      tpu.vector_store %arg16[%c0_41, %c0_42], %56 {strides = array<i32>} : memref<8x32xf32, #tpu.memory_space<vmem>>, vector<8x32xf32>,
      %c0_43 = arith.constant 0 : index
      %c0_44 = arith.constant 0 : index
      %80 = vector.load %arg17[%c0_43, %c0_44] : memref<8x32xf32, #tpu.memory_space<vmem>>, vector<8x32xf32>
      tpu.vector_store %arg17[%c0_43, %c0_44], %54 {strides = array<i32>} : memref<8x32xf32, #tpu.memory_space<vmem>>, vector<8x32xf32>,
      %c0_45 = arith.constant 0 : index
      %c0_46 = arith.constant 0 : index
      %81 = vector.load %arg18[%c0_45, %c0_46] : memref<8x32xf32, #tpu.memory_space<vmem>>, vector<8x32xf32>
      tpu.vector_store %arg18[%c0_45, %c0_46], %78 {strides = array<i32>} : memref<8x32xf32, #tpu.memory_space<vmem>>, vector<8x32xf32>,
      %c0_47 = arith.constant 0 : index
      %c0_48 = arith.constant 0 : index
      %82 = vector.load %arg19[%c0_47, %c0_48] : memref<8x8xf32, #tpu.memory_space<vmem>>, vector<8x8xf32>
      tpu.vector_store %arg19[%c0_47, %c0_48], %74 {strides = array<i32>} : memref<8x8xf32, #tpu.memory_space<vmem>>, vector<8x8xf32>,
    } else {
    }
    %c0 = arith.constant 0 : index
    %c0_1 = arith.constant 0 : index
    %3 = vector.load %arg18[%c0, %c0_1] : memref<8x32xf32, #tpu.memory_space<vmem>>, vector<8x32xf32>
    %4 = arith.truncf %3 : vector<8x32xf32> to vector<8x32xbf16>
    %c0_2 = arith.constant 0 : index
    %c0_3 = arith.constant 0 : index
    %5 = vector.load %arg9[%c0_2, %c0_3] : memref<32x128xbf16, #tpu.memory_space<vmem>>, vector<32x128xbf16>
    %cst = arith.constant dense<0.000000e+00> : vector<8x128xf32>
    %6 = tpu.matmul %4, %5, %cst {dimension_numbers = #tpu.dot_dimension_numbers<[1], [0], [0], [1], [0, 0, 1, 1], [], []>} : vector<8x32xbf16>, vector<32x128xbf16>, vector<8x128xf32> -> vector<8x128xf32>
    %c0_4 = arith.constant 0 : index
    %c0_5 = arith.constant 0 : index
    %7 = vector.load %arg16[%c0_4, %c0_5] : memref<8x32xf32, #tpu.memory_space<vmem>>, vector<8x32xf32>
    %8 = arith.truncf %7 : vector<8x32xf32> to vector<8x32xbf16>
    %c0_6 = arith.constant 0 : index
    %c0_7 = arith.constant 0 : index
    %9 = vector.load %arg10[%c0_6, %c0_7] : memref<32x128xbf16, #tpu.memory_space<vmem>>, vector<32x128xbf16>
    %cst_8 = arith.constant dense<0.000000e+00> : vector<8x128xf32>
    %10 = tpu.matmul %8, %9, %cst_8 {dimension_numbers = #tpu.dot_dimension_numbers<[1], [0], [0], [1], [0, 0, 1, 1], [], []>} : vector<8x32xbf16>, vector<32x128xbf16>, vector<8x128xf32> -> vector<8x128xf32>
    %11 = arith.addf %6, %10 : vector<8x128xf32>
    %c0_9 = arith.constant 0 : index
    %c0_10 = arith.constant 0 : index
    %12 = vector.load %arg11[%c0_9, %c0_10] : memref<1x128xf32, #tpu.memory_space<vmem>>, vector<1x128xf32>
    %13 = vector.broadcast %12 : vector<1x128xf32> to vector<8x128xf32>
    %14 = arith.addf %11, %13 : vector<8x128xf32>
    %c0_11 = arith.constant 0 : index
    %c0_12 = arith.constant 0 : index
    %15 = vector.load %arg12[%c0_11, %c0_12] : memref<8x128xf32, #tpu.memory_space<vmem>>, vector<8x128xf32>
    tpu.vector_store %arg12[%c0_11, %c0_12], %14 {strides = array<i32>} : memref<8x128xf32, #tpu.memory_space<vmem>>, vector<8x128xf32>,
    %c0_i32_13 = arith.constant 0 : i32
    %16 = arith.cmpi eq, %arg0, %c0_i32_13 : i32
    %17 = arith.extui %16 : i1 to i32
    %c0_i32_14 = arith.constant 0 : i32
    %18 = arith.cmpi ne, %17, %c0_i32_14 : i32
    scf.if %18 {
      %c0_15 = arith.constant 0 : index
      %c0_16 = arith.constant 0 : index
      %19 = vector.load %arg16[%c0_15, %c0_16] : memref<8x32xf32, #tpu.memory_space<vmem>>, vector<8x32xf32>
      %c0_17 = arith.constant 0 : index
      %c0_18 = arith.constant 0 : index
      %20 = vector.load %arg13[%c0_17, %c0_18] : memref<8x32xf32, #tpu.memory_space<vmem>>, vector<8x32xf32>
      tpu.vector_store %arg13[%c0_17, %c0_18], %19 {strides = array<i32>} : memref<8x32xf32, #tpu.memory_space<vmem>>, vector<8x32xf32>,
      %c0_19 = arith.constant 0 : index
      %c0_20 = arith.constant 0 : index
      %21 = vector.load %arg17[%c0_19, %c0_20] : memref<8x32xf32, #tpu.memory_space<vmem>>, vector<8x32xf32>
      %c0_21 = arith.constant 0 : index
      %c0_22 = arith.constant 0 : index
      %22 = vector.load %arg14[%c0_21, %c0_22] : memref<8x32xf32, #tpu.memory_space<vmem>>, vector<8x32xf32>
      tpu.vector_store %arg14[%c0_21, %c0_22], %21 {strides = array<i32>} : memref<8x32xf32, #tpu.memory_space<vmem>>, vector<8x32xf32>,
      %c0_23 = arith.constant 0 : index
      %c0_24 = arith.constant 0 : index
      %23 = vector.load %arg19[%c0_23, %c0_24] : memref<8x8xf32, #tpu.memory_space<vmem>>, vector<8x8xf32>
      %c0_25 = arith.constant 0 : index
      %c0_26 = arith.constant 0 : index
      %24 = vector.load %arg15[%c0_25, %c0_26] : memref<8x8xf32, #tpu.memory_space<vmem>>, vector<8x8xf32>
      tpu.vector_store %arg15[%c0_25, %c0_26], %23 {strides = array<i32>} : memref<8x8xf32, #tpu.memory_space<vmem>>, vector<8x8xf32>,
    } else {
    }
    return
  }
  func.func @transform_0(%arg0: i32) -> (i32, i32) {
    %c0_i32 = arith.constant 0 : i32
    %c0_i32_0 = arith.constant 0 : i32
    %c0_i32_1 = arith.constant 0 : i32
    return %c0_i32, %c0_i32_0 : i32, i32
  }
  func.func @transform_1(%arg0: i32) -> (i32, i32) {
    %c0_i32 = arith.constant 0 : i32
    %c0_i32_0 = arith.constant 0 : i32
    %c0_i32_1 = arith.constant 0 : i32
    return %c0_i32, %c0_i32_0 : i32, i32
  }
  func.func @transform_2(%arg0: i32) -> (i32, i32) {
    %c0_i32 = arith.constant 0 : i32
    %c0_i32_0 = arith.constant 0 : i32
    %c0_i32_1 = arith.constant 0 : i32
    return %c0_i32, %c0_i32_0 : i32, i32
  }
  func.func @transform_3(%arg0: i32) -> (i32, i32, i32) {
    %c0_i32 = arith.constant 0 : i32
    %c0_i32_0 = arith.constant 0 : i32
    %c0_i32_1 = arith.constant 0 : i32
    %c0_i32_2 = arith.constant 0 : i32
    return %c0_i32, %c0_i32_0, %c0_i32_1 : i32, i32, i32
  }
  func.func @transform_4(%arg0: i32) -> (i32, i32) {
    %c0_i32 = arith.constant 0 : i32
    %c0_i32_0 = arith.constant 0 : i32
    %c0_i32_1 = arith.constant 0 : i32
    return %c0_i32, %c0_i32_0 : i32, i32
  }
  func.func @transform_5(%arg0: i32) -> (i32, i32) {
    %c0_i32 = arith.constant 0 : i32
    %c0_i32_0 = arith.constant 0 : i32
    %c0_i32_1 = arith.constant 0 : i32
    return %c0_i32, %c0_i32_0 : i32, i32
  }
  func.func @transform_6(%arg0: i32) -> (i32, i32) {
    %c0_i32 = arith.constant 0 : i32
    %c0_i32_0 = arith.constant 0 : i32
    %c0_i32_1 = arith.constant 0 : i32
    return %c0_i32, %c0_i32_0 : i32, i32
  }
  func.func @transform_7(%arg0: i32) -> (i32, i32) {
    %c0_i32 = arith.constant 0 : i32
    %c0_i32_0 = arith.constant 0 : i32
    %c0_i32_1 = arith.constant 0 : i32
    return %c0_i32, %c0_i32_0 : i32, i32
  }
  func.func @transform_8(%arg0: i32) -> (i32, i32) {
    %c0_i32 = arith.constant 0 : i32
    %c0_i32_0 = arith.constant 0 : i32
    return %c0_i32, %arg0 : i32, i32
  }
  func.func @transform_9(%arg0: i32) -> (i32, i32) {
    %c0_i32 = arith.constant 0 : i32
    %c0_i32_0 = arith.constant 0 : i32
    return %c0_i32, %arg0 : i32, i32
  }
  func.func @transform_10(%arg0: i32) -> (i32, i32) {
    %c0_i32 = arith.constant 0 : i32
    %c0_i32_0 = arith.constant 0 : i32
    return %c0_i32, %arg0 : i32, i32
  }
  func.func @transform_11(%arg0: i32) -> (i32, i32) {
    %c0_i32 = arith.constant 0 : i32
    %c0_i32_0 = arith.constant 0 : i32
    return %c0_i32, %arg0 : i32, i32
  }
  func.func @transform_12(%arg0: i32) -> (i32, i32) {
    %c0_i32 = arith.constant 0 : i32
    %c0_i32_0 = arith.constant 0 : i32
    %c0_i32_1 = arith.constant 0 : i32
    return %c0_i32, %c0_i32_0 : i32, i32
  }
  func.func @transform_13(%arg0: i32) -> (i32, i32) {
    %c0_i32 = arith.constant 0 : i32
    %c0_i32_0 = arith.constant 0 : i32
    %c0_i32_1 = arith.constant 0 : i32
    return %c0_i32, %c0_i32_0 : i32, i32
  }
  func.func @transform_14(%arg0: i32) -> (i32, i32) {
    %c0_i32 = arith.constant 0 : i32
    %c0_i32_0 = arith.constant 0 : i32
    %c0_i32_1 = arith.constant 0 : i32
    return %c0_i32, %c0_i32_0 : i32, i32
  }
}

</mosaic_0001>

<bundles_post_ra>
// kernel: tpu_custom_call.1
= control target key start
LH: loop header
LB: loop body
LE: loop exit
PB: predicated region body
PF: predicated region fallthrough
CT: control target
= control target key end

     0   :  { %20 = vsyncpa [#allocation7], 0  ;;  %s2021_s0 = inlined_call_operand.hbm [shape: f32[8,16], index: 0, kind: input, shape index: {}]   ;;  %s2022_s1 = inlined_call_operand.hbm [shape: f32[8,32], index: 1, kind: input, shape index: {}]   ;;  %s2023_s2 = inlined_call_operand.hbm [shape: f32[8,32], index: 2, kind: input, shape index: {}]   ;;  %s2024_s3 = inlined_call_operand.hbm [shape: bf16[8,8,32], index: 3, kind: input, shape index: {}]   ;;  %s2025_s4 = inlined_call_operand.hbm [shape: f32[8,8], index: 4, kind: input, shape index: {}]   ;;  %s2026_s5 = inlined_call_operand.hbm [shape: bf16[16,128], index: 5, kind: input, shape index: {}]   ;;  %s2027_s6 = inlined_call_operand.hbm [shape: bf16[32,128], index: 6, kind: input, shape index: {}]   ;;  %s2028_s7 = inlined_call_operand.hbm [shape: f32[1,128], index: 7, kind: input, shape index: {}]   ;;  %s2029_s8 = inlined_call_operand.hbm [shape: bf16[32,128], index: 8, kind: input, shape index: {}]   ;;  %s2030_s9 = inlined_call_operand.vmem [shape: bf16[32,128], index: 9, kind: input, shape index: {}]   ;;  %s2031_s10 = inlined_call_operand.vmem [shape: f32[1,128], index: 10, kind: input, shape index: {}]   ;;  %s2032_s11 = inlined_call_operand.hbm [shape: f32[8,128], index: 11, kind: output, shape index: {0}]   ;;  %s2033_s12 = inlined_call_operand.hbm [shape: f32[8,32], index: 12, kind: output, shape index: {1}]   ;;  %s2034_s13 = inlined_call_operand.hbm [shape: f32[8,32], index: 13, kind: output, shape index: {2}]   ;;  %s2035_s14 = inlined_call_operand.hbm [shape: f32[8,8], index: 14, kind: output, shape index: {3}]  }
   0x1   :  { %21 = vsyncpa [#allocation10], 0 }
   0x2   :  { %22 = vsyncpa [#allocation13], 0 }
   0x3   :  { %23 = vsyncpa [#allocation16], 0 }
   0x4   :  { %24 = vsyncpa [#allocation19], 0 }
   0x5   :  { %25 = vsyncpa [#allocation8], 0 }
   0x6   :  { %26 = vsyncpa [#allocation23], 0 }
   0x7   :  { %27 = vsyncpa [#allocation26], 0  ;;  %s1597_s29 = smov [#allocation9]   ;;  %s1598_s15 = smov [#allocation12]  }
   0x8   :  { %s44_s30 = sshll.u32 %s1597_s29, 4  ;;  %s63_s16 = sshll.u32 %s1598_s15, 4  ;;  %s45_s30 = int_to_ptr.vmem [resolvable:$true] %s44_s30  ;;  %s64_s16 = int_to_ptr.vmem [resolvable:$true] %s63_s16 }
   0x9   :  { %s1329_s17 = scalar_lea.vmem %s45_s30, 128  ;;  %p1334_p1 = scmp.lt.s32.totalorder %s45_s30, %s45_s30 }
   0xa   :  { %p1330_p0 = scmp.ne.s32.totalorder %s45_s30, %s1329_s17  ;;  %p1335_p2 = scmp.lt.s32.totalorder %s1329_s17, %s1329_s17 }
   0xc   :  { %p1336_p3 = por %p1335_p2, %p1334_p1 }
   0xe   :  { %p1337_p4 = pnand %p1336_p3, %p1330_p0 }
  0x10   :  { %1340 = shalt.err (!%p1337_p4)
}
  0x11   :  { %47 = dma.hbm_to_vmem [thread:$0]  %s2022_s1, 128, %s45_s30, [#allocation10]  }
  0x12   :  { %s1349_s20 = scalar_lea.vmem %s64_s16, 512  ;;  %p1354_p6 = scmp.lt.s32.totalorder %s64_s16, %s64_s16 }
  0x13   :  { %p1350_p5 = scmp.ne.s32.totalorder %s64_s16, %s1349_s20  ;;  %p1355_p7 = scmp.lt.s32.totalorder %s1349_s20, %s1349_s20 }
  0x15   :  { %p1356_p8 = por %p1355_p7, %p1354_p6 }
  0x17   :  { %p1357_p9 = pnand %p1356_p8, %p1350_p5 }
  0x19   :  { %1360 = shalt.err (!%p1357_p9)
}
  0x1a   :  { %s1599_s21 = smov 64   ;;  %s1600_s22 = smov 4  }
  0x1b   :  { %69 = dma.hbm_to_vmem [thread:$0]  %s2024_s3, 512, %s64_s16, [#allocation13], %s1599_s21, %s1599_s21, %s1600_s22  }
  0x1c   :  { %s1601_s25 = smov [#allocation15]   ;;  %s1602_s27 = smov [#allocation18]  }
  0x1d   :  { %s85_s26 = sshll.u32 %s1601_s25, 4  ;;  %s110_s1 = sshll.u32 %s1602_s27, 4  ;;  %s86_s26 = int_to_ptr.vmem [resolvable:$true] %s85_s26  ;;  %s111_s1 = int_to_ptr.vmem [resolvable:$true] %s110_s1 }
  0x1e   :  { %s1369_s28 = scalar_lea.vmem %s86_s26, 128  ;;  %p1374_p11 = scmp.lt.s32.totalorder %s86_s26, %s86_s26 }
  0x1f   :  { %p1370_p10 = scmp.ne.s32.totalorder %s86_s26, %s1369_s28  ;;  %p1375_p12 = scmp.lt.s32.totalorder %s1369_s28, %s1369_s28 }
  0x21   :  { %p1376_p13 = por %p1375_p12, %p1374_p11 }
  0x23   :  { %p1377_p0 = pnand %p1376_p13, %p1370_p10 }
  0x25   :  { %1380 = shalt.err (!%p1377_p0)
}
  0x26   :  { %91 = dma.hbm_to_vmem [thread:$0]  %s2026_s5, 128, %s86_s26, [#allocation16], %s1599_s21, %s1599_s21, %s1600_s22  }
  0x27   :  { %s1389_s3 = scalar_lea.vmem %s111_s1, 16  ;;  %s1393_s15 = scalar_lea.vmem %s111_s1, 32 }
  0x28   :  { %p1390_p1 = scmp.ne.s32.totalorder %s111_s1, %s1389_s3  ;;  %p1394_p2 = scmp.lt.s32.totalorder %s111_s1, %s111_s1 }
  0x29   :  { %p1395_p3 = scmp.lt.s32.totalorder %s1393_s15, %s1389_s3 }
  0x2b   :  { %p1396_p4 = por %p1395_p3, %p1394_p2 }
  0x2d   :  { %p1397_p5 = pnand %p1396_p4, %p1390_p1 }
  0x2f   :  { %1400 = shalt.err (!%p1397_p5)
}
  0x30   :  { %113 = dma.hbm_to_vmem [thread:$0]  %s2028_s7, 16, %s111_s1, [#allocation19]  }
  0x31   :  { %s1603_s18 = smov [#allocation6]   ;;  %s1604_s20 = smov [#allocation11]  }
  0x32   :  { %s34_s19 = sshll.u32 %s1603_s18, 4  ;;  %s54_s23 = sshll.u32 %s1604_s20, 4  ;;  %s35_s19 = int_to_ptr.vmem [resolvable:$true] %s34_s19  ;;  %s55_s23 = int_to_ptr.vmem [resolvable:$true] %s54_s23 }
  0x33   :  { %s1409_s24 = scalar_lea.vmem %s35_s19, 128  ;;  %p1414_p7 = scmp.lt.s32.totalorder %s35_s19, %s35_s19 }
  0x34   :  { %p1410_p6 = scmp.ne.s32.totalorder %s35_s19, %s1409_s24  ;;  %p1415_p8 = scmp.lt.s32.totalorder %s1409_s24, %s1409_s24 }
  0x36   :  { %p1416_p9 = por %p1415_p8, %p1414_p7 }
  0x38   :  { %p1417_p10 = pnand %p1416_p9, %p1410_p6 }
  0x3a   :  { %1420 = shalt.err (!%p1417_p10)
}
  0x3b   :  { %37 = dma.hbm_to_vmem [thread:$0]  %s2021_s0, 128, %s35_s19, [#allocation7]  }
  0x3c   :  { %s1429_s26 = scalar_lea.vmem %s55_s23, 128  ;;  %p1434_p12 = scmp.lt.s32.totalorder %s55_s23, %s55_s23 }
  0x3d   :  { %p1430_p11 = scmp.ne.s32.totalorder %s55_s23, %s1429_s26  ;;  %p1435_p13 = scmp.lt.s32.totalorder %s1429_s26, %s1429_s26 }
  0x3f   :  { %p1436_p0 = por %p1435_p13, %p1434_p12 }
  0x41   :  { %p1437_p1 = pnand %p1436_p0, %p1430_p11 }
  0x43   :  { %1440 = shalt.err (!%p1437_p1)
}
  0x44   :  { %57 = dma.hbm_to_vmem [thread:$0]  %s2023_s2, 128, %s55_s23, [#allocation10]  }
  0x45   :  { %s1605_s1 = smov [#allocation14]   ;;  %s1606_s29 = smov [#allocation17]  }
  0x46   :  { %s76_s28 = sshll.u32 %s1605_s1, 4  ;;  %s97_s30 = sshll.u32 %s1606_s29, 4  ;;  %s77_s28 = int_to_ptr.vmem [resolvable:$true] %s76_s28  ;;  %s98_s30 = int_to_ptr.vmem [resolvable:$true] %s97_s30 }
  0x47   :  { %s1449_s3 = scalar_lea.vmem %s77_s28, 128  ;;  %p1454_p3 = scmp.lt.s32.totalorder %s77_s28, %s77_s28 }
  0x48   :  { %p1450_p2 = scmp.ne.s32.totalorder %s77_s28, %s1449_s3  ;;  %p1455_p4 = scmp.lt.s32.totalorder %s1449_s3, %s1449_s3 }
  0x4a   :  { %p1456_p5 = por %p1455_p4, %p1454_p3 }
  0x4c   :  { %p1457_p6 = pnand %p1456_p5, %p1450_p2 }
  0x4e   :  { %1460 = shalt.err (!%p1457_p6)
}
  0x4f   :  { %79 = dma.hbm_to_vmem [thread:$0]  %s2025_s4, 128, %s77_s28, [#allocation13]  }
  0x50   :  { %s1469_s16 = scalar_lea.vmem %s98_s30, 256  ;;  %p1474_p8 = scmp.lt.s32.totalorder %s98_s30, %s98_s30 }
  0x51   :  { %p1470_p7 = scmp.ne.s32.totalorder %s98_s30, %s1469_s16  ;;  %p1475_p9 = scmp.lt.s32.totalorder %s1469_s16, %s1469_s16 }
  0x53   :  { %p1476_p10 = por %p1475_p9, %p1474_p8 }
  0x55   :  { %p1477_p11 = pnand %p1476_p10, %p1470_p7 }
  0x57   :  { %1480 = shalt.err (!%p1477_p11)
}
  0x58   :  { %103 = dma.hbm_to_vmem [thread:$0]  %s2027_s6, 256, %s98_s30, [#allocation16], %s1599_s21, %s1599_s21, %s1600_s22  }
  0x59   :  { %s1607_s18 = smov [#allocation20]  }
  0x5a   :  { %s119_s19 = sshll.u32 %s1607_s18, 4  ;;  %s120_s19 = int_to_ptr.vmem [resolvable:$true] %s119_s19 }
  0x5b   :  { %s1489_s20 = scalar_lea.vmem %s120_s19, 256  ;;  %p1494_p13 = scmp.lt.s32.totalorder %s120_s19, %s120_s19 }
  0x5c   :  { %p1490_p12 = scmp.ne.s32.totalorder %s120_s19, %s1489_s20  ;;  %p1495_p0 = scmp.lt.s32.totalorder %s1489_s20, %s1489_s20 }
  0x5e   :  { %p1496_p1 = por %p1495_p0, %p1494_p13 }
  0x60   :  { %p1497_p2 = pnand %p1496_p1, %p1490_p12 }
  0x62   :  { %1500 = shalt.err (!%p1497_p2)
}
  0x63   :  { %125 = dma.hbm_to_vmem [thread:$0]  %s2029_s8, 256, %s120_s19, [#allocation19], %s1599_s21, %s1599_s21, %s1600_s22  }
  0x64   :  { %1581 = dma.done.wait [#allocation7], 128  }
  0x65   :  { %1582 = vsyncadd [#allocation7], 4294967168 }
  0x66   :  { %1583 = dma.done.wait [#allocation10], 256  }
  0x67   :  { %1584 = vsyncadd [#allocation10], 4294967040 }
  0x68   :  { %1585 = dma.done.wait [#allocation13], 640  }
  0x69   :  { %1586 = vsyncadd [#allocation13], 4294966656 }
  0x6a   :  { %1587 = dma.done.wait [#allocation16], 384  }
  0x6b   :  { %1588 = vsyncadd [#allocation16], 4294966912 }
  0x6c   :  { %1589 = dma.done.wait [#allocation19], 272  }
  0x6d   :  { %1590 = vsyncadd [#allocation19], 4294967024  ;;  %v1608_v0 = vmov 0.0   ;;  %vm1609_vm0 = vmmov 0   ;;  %v1288_v1 = vld [vmem:[#allocation17 + $0x8] sm:$0xff]   ;;  %v1289_v2 = vld [vmem:[#allocation15] sm:$0xff]   ;;  %v336_v28 = vlaneseq }
  0x6e   :  { %1235 = vmatprep.subr.bf16.mxu0 %v1608_v0  ;;  %1243 = vmatprep.subr.bf16.mxu1 %v1608_v0  ;;  %v162_v3 = vld [vmem:[#allocation6] sm:$0xff]  ;;  %vm234_vm1 = vcmask 130048   ;;  %v1290_v5 = vld [vmem:[#allocation17] sm:$0xff]   ;;  %vm184_vm2 = vcmask 261120   ;;  %v1196_v11 = vld [vmem:[#allocation18] ss:$0 sm:$0xff] }
  0x6f   :  { %1245 = vmatprep.mubr.msk.bf16.mxu1 %vm1609_vm0, %v1608_v0  ;;  %1239 = vmatprep.mubr.msk.bf16.mxu0 %vm1609_vm0, %v1608_v0  ;;  %v163_v4 = vpack.c.bf16 %v162_v3, %v162_v3  ;;  %v166_v6 = vld [vmem:[#allocation9] sm:$0xff]  ;;  %v293_v20 = vld [vmem:[#allocation11] sm:$0xff]  ;;  %s1610_s6 = smov 32   ;;  %v1752_v32 = vshrl.u32 %v336_v28, 7  ;;  %v1758_v34 = vld [vmem:[#allocation14] sm:$0xff]  ;;  %vm609_vm3 = vcmask 1041409  }
  0x70   :  { %1236 = vmatpush3.bf16.msra.mxu0 %v1288_v1  ;;  %1244 = vmatpush3.bf16.msra.mxu1 %v1289_v2  ;;  %v167_v7 = vpack.c.bf16 %v166_v6, %v166_v6  ;;  %v1611_v39 = vmov 1966171168   ;;  %vm611_vm4 = vcmask 1042434   ;;  %vm613_vm5 = vcmask 1043459   ;;  %s1613_s8 = smov 96  }
  0x71   :  { %1237 = vmatprep.subr.bf16.mxu0 %v1608_v0  ;;  %1249 = vmatprep.subr.bf16.mxu1 %v1608_v0  ;;  %v1756_v33 = vsub.s32 1, %v1752_v32  ;;  %v1763_v36 = vsub.s32 0, %v1752_v32  ;;  %v334_v40 = vunpack.c.l.s4 %v1611_v39  ;;  %v1786_v1 = vsub.s32 4, %v1752_v32 }
  0x72   :  { %v1791_v3 = vsub.s32 2, %v1752_v32  ;;  %vm615_vm6 = vcmask 1044484   ;;  %vm617_vm7 = vcmask 1045509   ;;  %vm619_vm8 = vcmask 1046534  }
  0x73   :  { %1246 = vmatmul.mubr.msk.bf16.vlgmr.msra.gmra.mxu1 %vm234_vm1, %v163_v4  ;;  %v481_v35 = vrot.slane %v1758_v34, %v1756_v33  ;;  %v474_v38 = vrot.slane %v1758_v34, %v1763_v36  ;;  %v335_v41 = vunpack.c.0.s8 %v334_v40  ;;  %vm621_vm9 = vcmask 1047559  }
  0x74   :  { %1238 = vmatpush3.bf16.msra.mxu0 %v1290_v5  ;;  %1253 = vmatprep.mubr.msk.bf16.mxu1 %vm1609_vm0, %v1608_v0  ;;  %v502_v5 = vrot.slane %v1758_v34, %v1786_v1  ;;  %v488_v6 = vrot.slane %v1758_v34, %v1791_v3  ;;  %vm624_vm10 = vcmask 64512  }
  0x75   :  { %1257 = vmatprep.subr.bf16.mxu0 %v1608_v0  ;;  %v338_v42 = vsub.s32 %v335_v41, %v1752_v32 }
  0x77   :  { %1240 = vmatmul.mubr.msk.bf16.vlgmr.msra.gmra.mxu0 %vm184_vm2, %v167_v7  ;;  %v1801_v7 = vsub.s32 3, %v1752_v32 }
  0x78   :  { %1261 = vmatprep.mubr.msk.bf16.mxu0 %vm1609_vm0, %v1608_v0 }
 0x133   :  { %v272_v8 = vpop.f32.mrf.mxu1 }
 0x135   :  { %v1247_v9 = vpop.f32.mrf.mxu1 }
 0x136   :  { %v1806_v9 = vsub.s32 5, %v1752_v32 }
 0x137   :  { %v222_v10 = vpop.f32.mrf.mxu0  ;;  %v275_v13 = vpop.f32.mrf.mxu1 }
 0x138   :  { %v273_v12 = vadd.f32 %v272_v8, %v222_v10  ;;  %v495_v8 = vrot.slane %v1758_v34, %v1801_v7  ;;  %v509_v10 = vrot.slane %v1758_v34, %v1806_v9 }
 0x139   :  { %v1241_v14 = vpop.f32.mrf.mxu0  ;;  %v1248_v16 = vpop.f32.mrf.mxu1 }
 0x13a   :  { %v285_v15 = vadd.f32 %v1196_v11, %v273_v12  ;;  %v1810_v12 = vld [vmem:[#allocation12] sm:$0xff]  }
 0x13b   :  { %v225_v17 = vpop.f32.mrf.mxu0  ;;  %v1207_v14 = vunpack.c.l.bf16 %v1810_v12  ;;  %v1208_v16 = vunpack.c.h.bf16 %v1810_v12 }
 0x13c   :  { %1295 = vtanh.f32 %v285_v15  ;;  %v1197_v21 = vmul.f32 -1.442695, %v285_v15  ;;  %v1813_v15 = vld [vmem:[#allocation12 + $0x8] sm:$0xff]  }
 0x13d   :  { %v1242_v18 = vpop.f32.mrf.mxu0 }
 0x13e   :  { %1297 = vpow2.f32 %v1197_v21  ;;  %v1819_v21 = vld [vmem:[#allocation12 + $0x10] sm:$0xff]  }
 0x13f   :  { %v1216_v39 = vunpack.c.h.bf16 %v1819_v21 }
 0x149   :  { %v1296_v19 = vpop.eup %1295 }
 0x14a   :  { %300 = vrot.lane.b32.xlu0 %v1296_v19, %s1599_s21  ;;  %v1211_v19 = vunpack.c.l.bf16 %v1813_v15 }
 0x14b   :  { %v1298_v22 = vpop.eup %1297 }
 0x14c   :  { %v289_v23 = vadd.f32 1.0, %v1298_v22 }
 0x14e   :  { %295 = vrot.lane.b32.xlu0 %v293_v20, %s1610_s6  ;;  %1299 = vrcp.f32 %v289_v23 }
 0x152   :  { %483 = vbcast.lane.b32.xlu0 %v481_v35, 256  ;;  %v1829_v35 = vld [vmem:[#allocation12 + $0x18] sm:$0xff]  }
 0x15b   :  { %v1300_v24 = vpop.eup %1299 }
 0x1bc   :  { %v301_v25 = vpop.permute.xlu0 %300 }
 0x1bd   :  { %v303_v26 = vmul.f32 %v1300_v24, %v301_v25 }
 0x1bf   :  { %305 = vrot.lane.b32.xlu1 %v303_v26, %s1610_s6 }
 0x1c0   :  { %v296_v27 = vpop.permute.xlu0 %295 }
 0x1c1   :  { %v298_v29 = vmul.f32 %v1300_v24, %v296_v27 }
 0x1c4   :  { %v484_v11 = vpop.permute.xlu0 %483 }
 0x231   :  { %v306_v30 = vpop.permute.xlu1 %305 }
 0x232   :  { %v1749_v31 = vadd.f32 %v306_v30, %v298_v29  ;;  %v1215_v29 = vunpack.c.l.bf16 %v1819_v21 }
 0x234   :  { %1301 = vtanh.f32 %v1749_v31 }
 0x241   :  { %v1302_v37 = vpop.eup %1301 }
 0x242   :  { %311 = vrot.lane.b32.xlu1 %v1302_v37, %s1599_s21 }
 0x246   :  { %476 = vbcast.lane.b32.xlu1 %v474_v38, 256 }
 0x2b4   :  { %v312_v43 = vpop.permute.xlu1 %311 }
 0x2b5   :  { %v1769_v44 = vmul.f32 %v1300_v24, %v312_v43  ;;  %v1212_v24 = vunpack.c.h.bf16 %v1813_v15 }
 0x2b7   :  { %v332_v45 = vcombine.high %v1769_v44, %v1769_v44  ;;  %v339_v46 = vrot.slane %v1769_v44, %v338_v42 }
 0x2b8   :  { %v477_v13 = vpop.permute.xlu1 %476 }
 0x2b9   :  { %v346_v47 = vrot.slane %v332_v45, %v338_v42  ;;  %v347_v48 = vcombine.high %v339_v46, %v339_v46  ;;  %v355_v49 = vrot.slane %v339_v46, %v338_v42 }
 0x2bb   :  { %v384_v50 = vrot.slane %v355_v49, %v1763_v36  ;;  %v369_v51 = vrot.slane %v347_v48, %v338_v42  ;;  %v377_v52 = vcombine.high %v355_v49, %v355_v49  ;;  %v348_v55 = vcombine.high %v346_v47, %v346_v47 }
 0x2bc   :  { %v362_v57 = vrot.slane %v346_v47, %v338_v42  ;;  %v1220_v48 = vunpack.c.h.bf16 %v1829_v35 }
 0x2bd   :  { %413 = vrot.lane.b32.xlu0 %v384_v50, %s1610_s6  ;;  %v388_v53 = vrot.slane %v369_v51, %v1763_v36  ;;  %v379_v54 = vcombine.high %v369_v51, %v369_v51  ;;  %v392_v56 = vrot.slane %v377_v52, %v1763_v36  ;;  %v376_v59 = vrot.slane %v348_v55, %v338_v42 }
 0x2be   :  { %v400_v60 = vrot.slane %v362_v57, %v1763_v36  ;;  %v378_v61 = vcombine.high %v362_v57, %v362_v57  ;;  %v1219_v42 = vunpack.c.l.bf16 %v1829_v35  ;;  %v1612_v55 = vmov 0  }
 0x2bf   :  { %415 = vrot.lane.b32.xlu1 %v388_v53, %s1610_s6  ;;  %v396_v58 = vrot.slane %v379_v54, %v1763_v36  ;;  %v404_v62 = vrot.slane %v376_v59, %v1763_v36  ;;  %v380_v63 = vcombine.high %v376_v59, %v376_v59  ;;  %1286 = vset.pattern.permute.xlu0 %v1612_v55  ;;  %v1851_v57 = vsub.s32 7, %v1752_v32 }
 0x2c0   :  { %v408_v2 = vrot.slane %v378_v61, %v1763_v36  ;;  %1287 = vset.pattern.permute.xlu1 %v1612_v55  ;;  %v1856_v59 = vsub.s32 6, %v1752_v32 }
 0x2c1   :  { %417 = vrot.lane.b32.xlu0 %v392_v56, %s1610_s6  ;;  %v412_v4 = vrot.slane %v380_v63, %v1763_v36 }
 0x2c3   :  { %419 = vrot.lane.b32.xlu1 %v396_v58, %s1610_s6  ;;  %v523_v58 = vrot.slane %v1758_v34, %v1851_v57 }
 0x2c5   :  { %421 = vrot.lane.b32.xlu0 %v400_v60, %s1610_s6  ;;  %v516_v60 = vrot.slane %v1758_v34, %v1856_v59 }
 0x2c7   :  { %423 = vrot.lane.b32.xlu1 %v404_v62, %s1610_s6 }
 0x2c9   :  { %425 = vrot.lane.b32.xlu0 %v408_v2, %s1610_s6 }
 0x2cb   :  { %427 = vrot.lane.b32.xlu1 %v412_v4, %s1610_s6 }
 0x2cd   :  { %504 = vbcast.lane.b32.xlu0 %v502_v5, 256 }
 0x2cf   :  { %490 = vbcast.lane.b32.xlu1 %v488_v6, 256 }
 0x2d3   :  { %497 = vbcast.lane.b32.xlu1 %v495_v8, 256 }
 0x2d7   :  { %511 = vbcast.lane.b32.xlu1 %v509_v10, 256 }
 0x32f   :  { %v414_v17 = vpop.permute.xlu0 %413 }
 0x330   :  { %v437_v18 = vmul.f32 %v1207_v14, %v414_v17 }
 0x331   :  { %v416_v20 = vpop.permute.xlu1 %415 }
 0x332   :  { %v438_v22 = vmul.f32 %v1208_v16, %v416_v20  ;;  %v445_v23 = vsel %vm184_vm2, %v437_v18, 0.0 }
 0x333   :  { %v418_v25 = vpop.permute.xlu0 %417  ;;  %446 = vadd.xlane.f32.xlu0 %v445_v23 }
 0x334   :  { %v439_v26 = vmul.f32 %v1211_v19, %v418_v25  ;;  %v448_v27 = vsel %vm184_vm2, %v438_v22, 0.0 }
 0x335   :  { %449 = vadd.xlane.f32.xlu1 %v448_v27  ;;  %v420_v30 = vpop.permute.xlu1 %419 }
 0x336   :  { %v440_v37 = vmul.f32 %v1212_v24, %v420_v30  ;;  %v451_v38 = vsel %vm184_vm2, %v439_v26, 0.0 }
 0x337   :  { %v422_v40 = vpop.permute.xlu0 %421  ;;  %452 = vadd.xlane.f32.xlu0 %v451_v38  ;;  %v576_v38 = vand.u32 127, %v336_v28 }
 0x338   :  { %v441_v41 = vmul.f32 %v1215_v29, %v422_v40  ;;  %v454_v47 = vsel %vm184_vm2, %v440_v37, 0.0 }
 0x339   :  { %v424_v43 = vpop.permute.xlu1 %423 }
 0x33a   :  { %v442_v45 = vmul.f32 %v1216_v39, %v424_v43  ;;  %v457_v46 = vsel %vm184_vm2, %v441_v41, 0.0  ;;  %v1883_v43 = vsub.s32 %v576_v38, %v1752_v32 }
 0x33b   :  { %v426_v49 = vpop.permute.xlu0 %425  ;;  %458 = vadd.xlane.f32.xlu1 %v457_v46  ;;  %455 = vadd.xlane.f32.xlu0 %v454_v47 }
 0x33c   :  { %v443_v50 = vmul.f32 %v1219_v42, %v426_v49  ;;  %v460_v54 = vsel %vm184_vm2, %v442_v45, 0.0 }
 0x33d   :  { %v428_v51 = vpop.permute.xlu1 %427 }
 0x33e   :  { %v444_v52 = vmul.f32 %v1220_v48, %v428_v51  ;;  %v463_v53 = vsel %vm184_vm2, %v443_v50, 0.0 }
 0x33f   :  { %464 = vadd.xlane.f32.xlu1 %v463_v53  ;;  %461 = vadd.xlane.f32.xlu0 %v460_v54  ;;  %v505_v63 = vpop.permute.xlu0 %504 }
 0x340   :  { %v466_v56 = vsel %vm184_vm2, %v444_v52, 0.0 }
 0x341   :  { %v491_v61 = vpop.permute.xlu1 %490 }
 0x343   :  { %467 = vadd.xlane.f32.xlu0 %v466_v56 }
 0x345   :  { %v498_v62 = vpop.permute.xlu1 %497 }
 0x349   :  { %v512_v2 = vpop.permute.xlu1 %511 }
 0x350   :  { %525 = vbcast.lane.b32.xlu1 %v523_v58, 256 }
 0x359   :  { %518 = vbcast.lane.b32.xlu0 %v516_v60, 256 }
 0x3bc   :  { %v447_v4 = vpop.xlane.xlu0 %446 }
 0x3bd   :  { %v1860_v5 = vadd.f32 %v477_v13, %v447_v4 }
 0x3be   :  { %v450_v6 = vpop.xlane.xlu1 %449 }
 0x3bf   :  { %v1862_v8 = vadd.f32 %v484_v11, %v450_v6  ;;  %552 = vperm.xlu0 %1286, %v1860_v5  }
 0x3c0   :  { %v453_v10 = vpop.xlane.xlu0 %452 }
 0x3c1   :  { %555 = vperm.xlu1 %1287, %v1862_v8   ;;  %v537_v17 = vadd.f32 %v491_v61, %v453_v10 }
 0x3c4   :  { %v456_v18 = vpop.xlane.xlu0 %455  ;;  %v459_v20 = vpop.xlane.xlu1 %458 }
 0x3c5   :  { %v1866_v34 = vadd.f32 %v498_v62, %v456_v18  ;;  %558 = vperm.xlu1 %1287, %v537_v17   ;;  %v1868_v22 = vadd.f32 %v505_v63, %v459_v20 }
 0x3c7   :  { %561 = vperm.xlu0 %1286, %v1866_v34  }
 0x3c8   :  { %v462_v13 = vpop.xlane.xlu0 %461  ;;  %v465_v23 = vpop.xlane.xlu1 %464 }
 0x3c9   :  { %v1871_v25 = vadd.f32 %v512_v2, %v462_v13  ;;  %564 = vperm.xlu1 %1287, %v1868_v22  }
 0x3cb   :  { %567 = vperm.xlu0 %1286, %v1871_v25  }
 0x3cc   :  { %v468_v11 = vpop.xlane.xlu0 %467  ;;  %v526_v26 = vpop.permute.xlu1 %525 }
 0x3cd   :  { %v1875_v27 = vadd.f32 %v526_v26, %v468_v11 }
 0x3cf   :  { %573 = vperm.xlu0 %1286, %v1875_v27  }
 0x3d0   :  { %v519_v30 = vpop.permute.xlu0 %518 }
 0x3d1   :  { %v1878_v37 = vadd.f32 %v519_v30, %v465_v23 }
 0x3d3   :  { %570 = vperm.xlu1 %1287, %v1878_v37  }
 0x43a   :  { %v553_v41 = vpop.permute.xlu0 %552 }
 0x43b   :  { %v580_v50 = vrot.slane %v553_v41, %v1883_v43 }
 0x43c   :  { %v556_v40 = vpop.permute.xlu1 %555 }
 0x43d   :  { %v584_v46 = vrot.slane %v556_v40, %v1883_v43 }
 0x43f   :  { %v610_v51 = vsel %vm609_vm3, %v584_v46, %v580_v50 }
 0x440   :  { %v559_v45 = vpop.permute.xlu1 %558 }
 0x441   :  { %v588_v49 = vrot.slane %v559_v45, %v1883_v43 }
 0x442   :  { %v562_v47 = vpop.permute.xlu0 %561 }
 0x443   :  { %v592_v52 = vrot.slane %v562_v47, %v1883_v43  ;;  %v612_v53 = vsel %vm611_vm4, %v588_v49, %v610_v51 }
 0x444   :  { %v565_v28 = vpop.permute.xlu1 %564 }
 0x445   :  { %v596_v54 = vrot.slane %v565_v28, %v1883_v43  ;;  %v614_v55 = vsel %vm613_vm5, %v592_v52, %v612_v53 }
 0x446   :  { %v568_v32 = vpop.permute.xlu0 %567 }
 0x447   :  { %v600_v56 = vrot.slane %v568_v32, %v1883_v43  ;;  %v616_v58 = vsel %vm615_vm6, %v596_v54, %v614_v55 }
 0x449   :  { %v618_v63 = vsel %vm617_vm7, %v600_v56, %v616_v58 }
 0x44a   :  { %v574_v60 = vpop.permute.xlu0 %573 }
 0x44b   :  { %v608_v2 = vrot.slane %v574_v60, %v1883_v43 }
 0x44e   :  { %v571_v61 = vpop.permute.xlu1 %570 }
 0x44f   :  { %v604_v62 = vrot.slane %v571_v61, %v1883_v43 }
 0x451   :  { %v620_v4 = vsel %vm619_vm8, %v604_v62, %v618_v63 }
 0x452   :  { %v622_v6 = vsel %vm621_vm9, %v608_v2, %v620_v4 }
 0x453   :  { %v625_v10 = vsel %vm624_vm10, %v622_v6, -inf }
 0x454   :  { %626 = vmax.xlane.f32.xlu1 %v625_v10 }
 0x4dd   :  { %v627_v18 = vpop.xlane.xlu1 %626 }
 0x4de   :  { %v632_v20 = vrot.slane %v627_v18, %v1763_v36  ;;  %v636_v13 = vrot.slane %v627_v18, %v1756_v33  ;;  %v640_v23 = vrot.slane %v627_v18, %v1791_v3  ;;  %v644_v38 = vrot.slane %v627_v18, %v1801_v7 }
 0x4df   :  { %v648_v45 = vrot.slane %v627_v18, %v1786_v1  ;;  %v652_v49 = vrot.slane %v627_v18, %v1806_v9  ;;  %v660_v28 = vrot.slane %v627_v18, %v1851_v57 }
 0x4e0   :  { %v669_v11 = vsub.f32 %v1860_v5, %v632_v20  ;;  %v670_v26 = vsub.f32 %v1862_v8, %v636_v13  ;;  %v671_v40 = vsub.f32 %v537_v17, %v640_v23  ;;  %v672_v46 = vsub.f32 %v1866_v34, %v644_v38 }
 0x4e1   :  { %v673_v50 = vsub.f32 %v1868_v22, %v648_v45  ;;  %v656_v8 = vrot.slane %v627_v18, %v1856_v59  ;;  %v674_v51 = vsub.f32 %v1871_v25, %v652_v49  ;;  %v676_v22 = vsub.f32 %v1875_v27, %v660_v28 }
 0x4e2   :  { %v677_v30 = vmul.f32 1.442695, %v669_v11  ;;  %v679_v41 = vmul.f32 1.442695, %v670_v26  ;;  %v681_v47 = vmul.f32 1.442695, %v671_v40 }
 0x4e3   :  { %v683_v5 = vmul.f32 1.442695, %v672_v46  ;;  %v685_v17 = vmul.f32 1.442695, %v673_v50  ;;  %v675_v34 = vsub.f32 %v1878_v37, %v656_v8  ;;  %v687_v53 = vmul.f32 1.442695, %v674_v51 }
 0x4e4   :  { %1303 = vpow2.f32 %v677_v30  ;;  %v691_v25 = vmul.f32 1.442695, %v676_v22 }
 0x4e5   :  { %1305 = vpow2.f32 %v679_v41  ;;  %v689_v54 = vmul.f32 1.442695, %v675_v34 }
 0x4e6   :  { %1307 = vpow2.f32 %v681_v47 }
 0x4e7   :  { %1309 = vpow2.f32 %v683_v5 }
 0x4e8   :  { %1311 = vpow2.f32 %v685_v17 }
 0x4e9   :  { %1313 = vpow2.f32 %v687_v53 }
 0x4ea   :  { %1315 = vpow2.f32 %v689_v54 }
 0x4eb   :  { %1317 = vpow2.f32 %v691_v25 }
 0x4f1   :  { %v1304_v52 = vpop.eup %1303 }
 0x4f2   :  { %702 = vperm.xlu0 %1286, %v1304_v52   ;;  %v1306_v32 = vpop.eup %1305 }
 0x4f3   :  { %v1308_v55 = vpop.eup %1307 }
 0x4f4   :  { %v1310_v56 = vpop.eup %1309 }
 0x4f5   :  { %v1312_v58 = vpop.eup %1311 }
 0x4f6   :  { %705 = vperm.xlu0 %1286, %v1306_v32   ;;  %v1314_v60 = vpop.eup %1313 }
 0x4f7   :  { %v1316_v37 = vpop.eup %1315 }
 0x4f8   :  { %v1318_v61 = vpop.eup %1317 }
 0x4fa   :  { %708 = vperm.xlu0 %1286, %v1308_v55  }
 0x4fe   :  { %711 = vperm.xlu0 %1286, %v1310_v56  }
 0x502   :  { %714 = vperm.xlu0 %1286, %v1312_v58  }
 0x506   :  { %717 = vperm.xlu0 %1286, %v1314_v60  }
 0x50a   :  { %720 = vperm.xlu0 %1286, %v1316_v37  }
 0x50e   :  { %723 = vperm.xlu0 %1286, %v1318_v61  }
 0x56d   :  { %v703_v62 = vpop.permute.xlu0 %702 }
 0x56e   :  { %v728_v20 = vrot.slane %v703_v62, %v1883_v43 }
 0x571   :  { %v706_v63 = vpop.permute.xlu0 %705 }
 0x572   :  { %v732_v10 = vrot.slane %v706_v63, %v1883_v43 }
 0x574   :  { %v757_v26 = vsel %vm609_vm3, %v732_v10, %v728_v20 }
 0x575   :  { %v709_v27 = vpop.permute.xlu0 %708 }
 0x576   :  { %v736_v18 = vrot.slane %v709_v27, %v1883_v43 }
 0x578   :  { %v758_v38 = vsel %vm611_vm4, %v736_v18, %v757_v26 }
 0x579   :  { %v712_v2 = vpop.permute.xlu0 %711 }
 0x57a   :  { %v740_v13 = vrot.slane %v712_v2, %v1883_v43 }
 0x57c   :  { %v759_v41 = vsel %vm613_vm5, %v740_v13, %v758_v38 }
 0x57d   :  { %v715_v4 = vpop.permute.xlu0 %714 }
 0x57e   :  { %v744_v23 = vrot.slane %v715_v4, %v1883_v43 }
 0x580   :  { %v760_v45 = vsel %vm615_vm6, %v744_v23, %v759_v41 }
 0x581   :  { %v718_v6 = vpop.permute.xlu0 %717 }
 0x582   :  { %v748_v30 = vrot.slane %v718_v6, %v1883_v43 }
 0x584   :  { %v761_v47 = vsel %vm617_vm7, %v748_v30, %v760_v45 }
 0x585   :  { %v721_v11 = vpop.permute.xlu0 %720 }
 0x586   :  { %v752_v40 = vrot.slane %v721_v11, %v1883_v43 }
 0x588   :  { %v762_v50 = vsel %vm619_vm8, %v752_v40, %v761_v47 }
 0x589   :  { %v724_v46 = vpop.permute.xlu0 %723 }
 0x58a   :  { %v756_v49 = vrot.slane %v724_v46, %v1883_v43 }
 0x58c   :  { %v763_v5 = vsel %vm621_vm9, %v756_v49, %v762_v50 }
 0x58d   :  { %v765_v8 = vsel %vm624_vm10, %v763_v5, 0.0 }
 0x58e   :  { %766 = vadd.xlane.f32.xlu0 %v765_v8 }
 0x617   :  { %v767_v51 = vpop.xlane.xlu0 %766 }
 0x618   :  { %1319 = vrcp.f32 %v767_v51 }
 0x625   :  { %v1320_v17 = vpop.eup %1319 }
 0x626   :  { %v793_v28 = vrot.slane %v1320_v17, %v1806_v9  ;;  %v773_v34 = vrot.slane %v1320_v17, %v1763_v36  ;;  %v777_v54 = vrot.slane %v1320_v17, %v1756_v33  ;;  %v781_v62 = vrot.slane %v1320_v17, %v1791_v3  ;;  %v1292_v3 = vld [vmem:[%s2030_s9] sm:$0xff]  }
 0x627   :  { %v785_v27 = vrot.slane %v1320_v17, %v1801_v7  ;;  %v789_v4 = vrot.slane %v1320_v17, %v1786_v1  ;;  %v797_v36 = vrot.slane %v1320_v17, %v1856_v59  ;;  %v801_v33 = vrot.slane %v1320_v17, %v1851_v57  ;;  %v1291_v1 = vld [vmem:[%s2030_s9 + $0x8] sm:$0xff]   ;;  %v1294_v57 = vld [vmem:[#allocation20] sm:$0xff]   ;;  %s1614_s9 = smov [#allocation22]  }
 0x628   :  { %v815_v53 = vmul.f32 %v1314_v60, %v793_v28  ;;  %v810_v22 = vmul.f32 %v1304_v52, %v773_v34  ;;  %v811_v25 = vmul.f32 %v1306_v32, %v777_v54  ;;  %v812_v63 = vmul.f32 %v1308_v55, %v781_v62  ;;  %1250 = vmatpush3.bf16.msra.mxu1 %v1291_v1  ;;  %v1293_v7 = vld [vmem:[#allocation20 + $0x8] sm:$0xff]   ;;  %s1147_s25 = sshll.u32 %s1614_s9, 4  ;;  %s1148_s25 = int_to_ptr.vmem [resolvable:$true] %s1147_s25 }
 0x629   :  { %v813_v2 = vmul.f32 %v1310_v56, %v785_v27  ;;  %v814_v9 = vmul.f32 %v1312_v58, %v789_v4  ;;  %v816_v52 = vmul.f32 %v1316_v37, %v797_v36  ;;  %v817_v32 = vmul.f32 %v1318_v61, %v801_v33  ;;  %1251 = vmatprep.subr.bf16.mxu1 %v1608_v0  ;;  %s1501_s26 = scalar_lea.vmem %s1148_s25, 128  ;;  %p1506_p4 = scmp.lt.s32.totalorder %s1148_s25, %s1148_s25 }
 0x62a   :  { %845 = vperm.xlu0 %1286, %v815_v53   ;;  %820 = vperm.xlu1 %1287, %v810_v22   ;;  %p1502_p3 = scmp.ne.s32.totalorder %s1148_s25, %s1501_s26  ;;  %p1507_p5 = scmp.lt.s32.totalorder %s1501_s26, %s1501_s26 }
 0x62b   :  { %1258 = vmatpush3.bf16.msra.mxu0 %v1293_v7 }
 0x62c   :  { %1252 = vmatpush3.bf16.msra.mxu1 %v1292_v3  ;;  %1259 = vmatprep.subr.bf16.mxu0 %v1608_v0  ;;  %p1508_p6 = por %p1507_p5, %p1506_p4 }
 0x62e   :  { %825 = vperm.xlu1 %1287, %v811_v25   ;;  %p1509_p7 = pnand %p1508_p6, %p1502_p3 }
 0x62f   :  { %1260 = vmatpush3.bf16.msra.mxu0 %v1294_v57 }
 0x632   :  { %830 = vperm.xlu1 %1287, %v812_v63  }
 0x636   :  { %835 = vperm.xlu1 %1287, %v813_v2  }
 0x63a   :  { %840 = vperm.xlu1 %1287, %v814_v9  }
 0x63e   :  { %850 = vperm.xlu1 %1287, %v816_v52  }
 0x642   :  { %855 = vperm.xlu1 %1287, %v817_v32  }
 0x646   :  { %922 = vrot.lane.b32.xlu1 %v1769_v44, %s1610_s6 }
 0x64a   :  { %927 = vrot.lane.b32.xlu1 %v1749_v31, %s1613_s8 }
 0x6a5   :  { %v821_v44 = vpop.permute.xlu1 %820  ;;  %v846_v56 = vpop.permute.xlu0 %845 }
 0x6a6   :  { %v858_v31 = vmul.f32 %v1207_v14, %v821_v44  ;;  %v863_v61 = vmul.f32 %v1216_v39, %v846_v56  ;;  %v951_v46 = vrot.slane %v821_v44, %v1883_v43  ;;  %v971_v9 = vrot.slane %v846_v56, %v1883_v43 }
 0x6a8   :  { %v866_v59 = vsel %vm184_vm2, %v858_v31, 0.0  ;;  %v901_v20 = vsel %vm184_vm2, %v863_v61, 0.0 }
 0x6a9   :  { %v826_v55 = vpop.permute.xlu1 %825  ;;  %v867_v60 = vrot.slane %v866_v59, 4  ;;  %v902_v26 = vrot.slane %v901_v20, 4 }
 0x6aa   :  { %v859_v58 = vmul.f32 %v1208_v16, %v826_v55  ;;  %v955_v39 = vrot.slane %v826_v55, %v1883_v43 }
 0x6ab   :  { %v868_v18 = vadd.f32 %v867_v60, %v866_v59  ;;  %v903_v5 = vadd.f32 %v902_v26, %v901_v20 }
 0x6ac   :  { %v873_v37 = vsel %vm184_vm2, %v859_v58, 0.0  ;;  %v980_v51 = vsel %vm609_vm3, %v955_v39, %v951_v46 }
 0x6ad   :  { %v874_v6 = vrot.slane %v873_v37, 4  ;;  %v831_v0 = vpop.permute.xlu1 %830  ;;  %v869_v30 = vrot.slane %v868_v18, 2  ;;  %v904_v4 = vrot.slane %v903_v5, 2 }
 0x6ae   :  { %v860_v10 = vmul.f32 %v1211_v19, %v831_v0  ;;  %v959_v19 = vrot.slane %v831_v0, %v1883_v43 }
 0x6af   :  { %v875_v13 = vadd.f32 %v874_v6, %v873_v37  ;;  %v870_v8 = vadd.f32 %v869_v30, %v868_v18  ;;  %v905_v58 = vadd.f32 %v904_v4, %v903_v5 }
 0x6b0   :  { %v880_v14 = vsel %vm184_vm2, %v860_v10, 0.0  ;;  %v981_v34 = vsel %vm611_vm4, %v959_v19, %v980_v51 }
 0x6b1   :  { %v881_v23 = vrot.slane %v880_v14, 4  ;;  %v836_v12 = vpop.permute.xlu1 %835  ;;  %v876_v40 = vrot.slane %v875_v13, 2  ;;  %v871_v52 = vrot.slane %v870_v8, 1 }
 0x6b2   :  { %v861_v16 = vmul.f32 %v1212_v24, %v836_v12  ;;  %v963_v49 = vrot.slane %v836_v12, %v1883_v43 }
 0x6b3   :  { %v882_v11 = vadd.f32 %v881_v23, %v880_v14  ;;  %v877_v28 = vadd.f32 %v876_v40, %v875_v13  ;;  %v906_v23 = vrot.slane %v905_v58, 1 }
 0x6b4   :  { %v887_v38 = vsel %vm184_vm2, %v861_v16, 0.0  ;;  %v982_v62 = vsel %vm613_vm5, %v963_v49, %v981_v34 }
 0x6b5   :  { %v888_v41 = vrot.slane %v887_v38, 4  ;;  %v841_v45 = vpop.permute.xlu1 %840  ;;  %v883_v47 = vrot.slane %v882_v11, 2  ;;  %v878_v33 = vrot.slane %v877_v28, 1 }
 0x6b6   :  { %v862_v15 = vmul.f32 %v1215_v29, %v841_v45  ;;  %v967_v50 = vrot.slane %v841_v45, %v1883_v43  ;;  %v907_v45 = vadd.f32 %v906_v23, %v905_v58 }
 0x6b7   :  { %v889_v24 = vadd.f32 %v888_v41, %v887_v38  ;;  %v884_v25 = vadd.f32 %v883_v47, %v882_v11  ;;  %v879_v61 = vadd.f32 %v878_v33, %v877_v28 }
 0x6b8   :  { %v894_v17 = vsel %vm184_vm2, %v862_v15, 0.0  ;;  %v983_v27 = vsel %vm615_vm6, %v967_v50, %v982_v62 }
 0x6b9   :  { %v890_v53 = vrot.slane %v889_v24, 2  ;;  %v895_v22 = vrot.slane %v894_v17, 4  ;;  %v851_v54 = vpop.permute.xlu1 %850  ;;  %v885_v7 = vrot.slane %v884_v25, 1  ;;  %v984_v57 = vsel %vm617_vm7, %v971_v9, %v983_v27 }
 0x6ba   :  { %v864_v21 = vmul.f32 %v1219_v42, %v851_v54  ;;  %v975_v2 = vrot.slane %v851_v54, %v1883_v43 }
 0x6bb   :  { %v891_v29 = vadd.f32 %v890_v53, %v889_v24  ;;  %v896_v63 = vadd.f32 %v895_v22, %v894_v17 }
 0x6bc   :  { %v908_v36 = vsel %vm184_vm2, %v864_v21, 0.0  ;;  %v985_v56 = vsel %vm619_vm8, %v975_v2, %v984_v57 }
 0x6bd   :  { %v897_v32 = vrot.slane %v896_v63, 2  ;;  %v909_v1 = vrot.slane %v908_v36, 4  ;;  %v856_v3 = vpop.permute.xlu1 %855  ;;  %v892_v31 = vrot.slane %v891_v29, 1 }
 0x6be   :  { %v865_v42 = vmul.f32 %v1220_v48, %v856_v3  ;;  %v979_v44 = vrot.slane %v856_v3, %v1883_v43  ;;  %v886_v48 = vadd.f32 %v885_v7, %v884_v25  ;;  %v872_v43 = vadd.f32 %v871_v52, %v870_v8 }
 0x6bf   :  { %v898_v59 = vadd.f32 %v897_v32, %v896_v63  ;;  %v910_v55 = vadd.f32 %v909_v1, %v908_v36  ;;  %v893_v18 = vadd.f32 %v892_v31, %v891_v29 }
 0x6c0   :  { %v915_v60 = vsel %vm184_vm2, %v865_v42, 0.0  ;;  %v986_v37 = vsel %vm621_vm9, %v979_v44, %v985_v56  ;;  %v939_v12 = vsel %vm609_vm3, %v879_v61, %v872_v43 }
 0x6c1   :  { %v899_v6 = vrot.slane %v898_v59, 1  ;;  %v911_v0 = vrot.slane %v910_v55, 2  ;;  %v916_v10 = vrot.slane %v915_v60, 4  ;;  %988 = vst.msk [vmem:[#allocation5] sm:$0xff] %vm624_vm10, %v986_v37  ;;  %v923_v35 = vpop.permute.xlu1 %922  ;;  %v940_v30 = vsel %vm611_vm4, %v886_v48, %v939_v12 }
 0x6c2   :  { %925 = vst.msk [vmem:[#allocation2] sm:$0xff] %vm184_vm2, %v923_v35  ;;  %v941_v39 = vsel %vm613_vm5, %v893_v18, %v940_v30 }
 0x6c3   :  { %v912_v14 = vadd.f32 %v911_v0, %v910_v55  ;;  %v917_v20 = vadd.f32 %v916_v10, %v915_v60  ;;  %v900_v13 = vadd.f32 %v899_v6, %v898_v59 }
 0x6c5   :  { %v913_v16 = vrot.slane %v912_v14, 1  ;;  %v918_v11 = vrot.slane %v917_v20, 2  ;;  %v928_v26 = vpop.permute.xlu1 %927  ;;  %v942_v40 = vsel %vm615_vm6, %v900_v13, %v941_v39 }
 0x6c6   :  { %930 = vst.msk [vmem:[#allocation3] sm:$0xff] %vm184_vm2, %v928_v26  ;;  %v943_v15 = vsel %vm617_vm7, %v907_v45, %v942_v40 }
 0x6c7   :  { %v919_v38 = vadd.f32 %v918_v11, %v917_v20  ;;  %v914_v19 = vadd.f32 %v913_v16, %v912_v14 }
 0x6c8   :  { %v1128_v41 = vld [vmem:[#allocation5] sm:$0xff] }
 0x6c9   :  { %v920_v46 = vrot.slane %v919_v38, 1  ;;  %v995_v47 = vld [vmem:[#allocation2] sm:$0xff]  ;;  %1130 = vst.msk [vmem:[#allocation25] sm:$0xff] %vm624_vm10, %v1128_v41  ;;  %v944_v50 = vsel %vm619_vm8, %v914_v19, %v943_v15 }
 0x6ca   :  { %v996_v49 = vpack.c.bf16 %v995_v47, %v995_v47  ;;  %1125 = vst.msk [vmem:[#allocation22] sm:$0xff] %vm184_vm2, %v995_v47 }
 0x6cb   :  { %v921_v24 = vadd.f32 %v920_v46, %v919_v38 }
 0x6cc   :  { %1254 = vmatmul.mubr.msk.bf16.vlgmr.msra.gmra.mxu1 %vm184_vm2, %v996_v49 }
 0x6cd   :  { %v945_v5 = vsel %vm621_vm9, %v921_v24, %v944_v50  ;;  %v1126_v8 = vld [vmem:[#allocation3] sm:$0xff] }
 0x6ce   :  { %947 = vst.msk [vmem:[#allocation4] sm:$0xff] %vm184_vm2, %v945_v5  ;;  %1127 = vst.msk [vmem:[#allocation24] sm:$0xff] %vm184_vm2, %v1126_v8 }
 0x6d5   :  { %v989_v51 = vld [vmem:[#allocation4] sm:$0xff] }
 0x6d6   :  { %v990_v17 = vpack.c.bf16 %v989_v51, %v989_v51 }
 0x6d8   :  { %1262 = vmatmul.mubr.msk.bf16.vlgmr.msra.gmra.mxu0 %vm184_vm2, %v990_v17 }
 0x6d9   :  { %1512 = shalt.err (!%p1509_p7)
}
 0x6da   :  { %1150 = dma.vmem_to_hbm [thread:$0]  %s1148_s25, 128, %s2033_s12, [#allocation23]  }
 0x6db   :  { %s1615_s1 = smov [#allocation24]   ;;  %s1616_s29 = smov [#allocation25]  }
 0x6dc   :  { %s1157_s28 = sshll.u32 %s1615_s1, 4  ;;  %s1167_s30 = sshll.u32 %s1616_s29, 4  ;;  %s1158_s28 = int_to_ptr.vmem [resolvable:$true] %s1157_s28  ;;  %s1168_s30 = int_to_ptr.vmem [resolvable:$true] %s1167_s30 }
 0x6dd   :  { %s1521_s3 = scalar_lea.vmem %s1158_s28, 128  ;;  %p1526_p9 = scmp.lt.s32.totalorder %s1158_s28, %s1158_s28 }
 0x6de   :  { %p1522_p8 = scmp.ne.s32.totalorder %s1158_s28, %s1521_s3  ;;  %p1527_p10 = scmp.lt.s32.totalorder %s1521_s3, %s1521_s3 }
 0x6e0   :  { %p1528_p11 = por %p1527_p10, %p1526_p9 }
 0x6e2   :  { %p1529_p12 = pnand %p1528_p11, %p1522_p8 }
 0x6e4   :  { %1532 = shalt.err (!%p1529_p12)
}
 0x6e5   :  { %1160 = dma.vmem_to_hbm [thread:$0]  %s1158_s28, 128, %s2034_s13, [#allocation23]  }
 0x6e6   :  { %s1541_s16 = scalar_lea.vmem %s1168_s30, 128  ;;  %p1546_p0 = scmp.lt.s32.totalorder %s1168_s30, %s1168_s30 }
 0x6e7   :  { %p1542_p13 = scmp.ne.s32.totalorder %s1168_s30, %s1541_s16  ;;  %p1547_p1 = scmp.lt.s32.totalorder %s1541_s16, %s1541_s16 }
 0x6e9   :  { %p1548_p2 = por %p1547_p1, %p1546_p0 }
 0x6eb   :  { %p1549_p3 = pnand %p1548_p2, %p1542_p13 }
 0x6ed   :  { %1552 = shalt.err (!%p1549_p3)
}
 0x6ee   :  { %1170 = dma.vmem_to_hbm [thread:$0]  %s1168_s30, 128, %s2035_s14, [#allocation26]   ;;  %v1204_v25 = vld [vmem:[%s2031_s10] ss:$0 sm:$0xff] }
 0x6ef   :  { %s1617_s13 = smov [#allocation21]  }
 0x6f0   :  { %s1137_s19 = sshll.u32 %s1617_s13, 4  ;;  %s1138_s19 = int_to_ptr.vmem [resolvable:$true] %s1137_s19 }
 0x6f1   :  { %s1561_s20 = scalar_lea.vmem %s1138_s19, 128  ;;  %p1566_p5 = scmp.lt.s32.totalorder %s1138_s19, %s1138_s19 }
 0x6f2   :  { %p1562_p4 = scmp.ne.s32.totalorder %s1138_s19, %s1561_s20  ;;  %p1567_p6 = scmp.lt.s32.totalorder %s1561_s20, %s1561_s20 }
 0x6f4   :  { %p1568_p7 = por %p1567_p6, %p1566_p5 }
 0x6f6   :  { %p1569_p8 = pnand %p1568_p7, %p1562_p4 }
 0x78c   :  { %v1051_v28 = vpop.f32.mrf.mxu1 }
 0x78e   :  { %v1255_v34 = vpop.f32.mrf.mxu1 }
 0x790   :  { %v1054_v53 = vpop.f32.mrf.mxu1 }
 0x792   :  { %v1256_v22 = vpop.f32.mrf.mxu1 }
 0x798   :  { %v1106_v54 = vpop.f32.mrf.mxu0 }
 0x799   :  { %v1107_v62 = vadd.f32 %v1106_v54, %v1051_v28 }
 0x79a   :  { %v1263_v21 = vpop.f32.mrf.mxu0 }
 0x79b   :  { %v1119_v29 = vadd.f32 %v1204_v25, %v1107_v62 }
 0x79c   :  { %v1109_v63 = vpop.f32.mrf.mxu0 }
 0x79d   :  { %1120 = vst [vmem:[#allocation21] sm:$0xff] %v1119_v29 }
 0x79e   :  { %v1264_v27 = vpop.f32.mrf.mxu0 }
 0x79f   :  { %1572 = shalt.err (!%p1569_p8)
}
 0x7a0   :  { %1140 = dma.vmem_to_hbm [thread:$0]  %s1138_s19, 128, %s2032_s11, [#allocation8]  }
 0x7a1   :  { %1591 = dma.done.wait [#allocation8], 128  }
 0x7a2   :  { %1592 = vsyncadd [#allocation8], 4294967168 }
 0x7a3   :  { %1593 = dma.done.wait [#allocation23], 256  }
 0x7a4   :  { %1594 = vsyncadd [#allocation23], 4294967040 }
 0x7a5   :  { %1595 = dma.done.wait [#allocation26], 128  }
 0x7a6   :  { %1596 = vsyncadd [#allocation26], 4294967168 }
 0x7a7   :  { %1183 = vsyncpa [#allocation7], 1 }
 0x7a8   :  { %1184 = vsyncpa [#allocation10], 1 }
 0x7a9   :  { %1185 = vsyncpa [#allocation13], 1 }
 0x7aa   :  { %1186 = vsyncpa [#allocation16], 1 }
 0x7ab   :  { %1187 = vsyncpa [#allocation19], 1 }
 0x7ac   :  { %1188 = vsyncpa [#allocation8], 1 }
 0x7ad   :  { %1189 = vsyncpa [#allocation23], 1 }
 0x7ae   :  { %1190 = vsyncpa [#allocation26], 1 }

</bundles_post_ra>
